<compile_context>
chip_gen: v7x
topology: tpu7x:2x2x1
jax: 0.10.0
libtpu: 0.0.40
codegen_flags: <defaults>
</compile_context>

<pallas_src>
import jax
import jax.numpy as jnp
from jax.experimental import pallas as pl
from jax.experimental.pallas import tpu as pltpu

# ---- static module hyper-parameters (args.*) ----
N_FEAT   = 32    # n_feat
GN_DIM   = 32    # args.z1_gn_dim
MLP_HID  = 32    # eval(args.z1_mlp_dims) == [32]
Z1_DIM   = 16    # args.z1_dim
N_NODES  = 64    # number of graph nodes
K_ADJS   = 3     # len(comm_adjs) == len(diff_adjs)

OUT_DIM  = 2 * Z1_DIM  # 32 == GN_DIM == MLP_HID == N_FEAT (allows weight packing)


def p_z1_gs_e1_kernel(wb_ref,      # SMEM (2,)            weight_b
                      adjs_ref,    # VMEM (2K, N, N)       [comm_adjs ; diff_adjs]
                      feats_ref,   # VMEM (N, F)
                      w_ref,       # VMEM (4*32, 32)       [W1 ; W2 ; Wm1 ; Wm2]
                      b_ref,       # VMEM (4, 32)          [b1 ; b2 ; bm1 ; bm2]
                      out_ref):    # VMEM (N, 2*Z1_DIM)    [mu | logvar]
    # Fold the 1/K of the mean pooling into the weight_b scalars (scalar unit).
    inv_k = 1.0 / K_ADJS
    s0 = wb_ref[0] * inv_k
    s1 = wb_ref[1] * inv_k

    # pooling_aggregation (mean) + stack/weight_b mix, via sums + scaled adds.
    comm_sum = jnp.sum(adjs_ref[0:K_ADJS], axis=0)
    diff_sum = jnp.sum(adjs_ref[K_ADJS:2 * K_ADJS], axis=0)
    final_a = comm_sum * s0 + diff_sum * s1

    # Unpack the packed weight / bias slabs (static slices, no runtime cost).
    w1 = w_ref[0 * GN_DIM:1 * GN_DIM, :]
    w2 = w_ref[1 * GN_DIM:2 * GN_DIM, :]
    wm1 = w_ref[2 * GN_DIM:3 * GN_DIM, :]
    wm2 = w_ref[3 * GN_DIM:4 * GN_DIM, :]
    b1 = b_ref[0:1, :]
    b2 = b_ref[1:2, :]
    bm1 = b_ref[2:3, :]
    bm2 = b_ref[3:4, :]

    x = feats_ref[...]
    # gc1: relu(A @ X @ W1 + b1); gc1_drop is identity in eval mode
    ax = jnp.dot(final_a, x, preferred_element_type=jnp.float32)
    u1 = jnp.maximum(
        jnp.dot(ax, w1, preferred_element_type=jnp.float32) + b1, 0.0)
    # gc2: A @ U1 @ W2 + b2
    au1 = jnp.dot(final_a, u1, preferred_element_type=jnp.float32)
    u2 = jnp.dot(au1, w2, preferred_element_type=jnp.float32) + b2
    final_u = (u1 + u2) * 0.5

    # MLP, dis_agg == 'concat' branch; mlp_drop is identity in eval mode
    h = jnp.maximum(
        jnp.dot(final_u, wm1, preferred_element_type=jnp.float32) + bm1, 0.0)
    h = jnp.dot(h, wm2, preferred_element_type=jnp.float32) + bm2

    # Single lane-contiguous 32-wide store; mu/logvar are sliced in the wrapper.
    out_ref[...] = h


def p_z1_gs_e1_forward(weight_b, comm_adjs, diff_adjs, feats, params):
    """weight_b: (2,) f32; comm_adjs/diff_adjs: (K, N, N); feats: (N, F)."""
    n = feats.shape[0]
    w1, b1, w2, b2, wm1, bm1, wm2, bm2 = params

    # Pack inputs to cut the input DMA count (all weights are 32x32, biases 1x32).
    adjs = jnp.concatenate([comm_adjs, diff_adjs], axis=0)           # (2K, N, N)
    w_pack = jnp.concatenate([w1, w2, wm1, wm2], axis=0)             # (128, 32)
    b_pack = jnp.concatenate([b1, b2, bm1, bm2], axis=0)             # (4, 32)

    vmem = pl.BlockSpec(memory_space=pltpu.MemorySpace.VMEM)
    smem = pl.BlockSpec(memory_space=pltpu.MemorySpace.SMEM)

    flops = 2 * (2 * n * n * GN_DIM + 4 * n * GN_DIM * GN_DIM)
    bytes_accessed = 4 * (adjs.size + feats.size + w_pack.size + b_pack.size
                          + weight_b.size + n * OUT_DIM)

    h = pl.pallas_call(
        p_z1_gs_e1_kernel,
        out_shape=jax.ShapeDtypeStruct((n, OUT_DIM), jnp.float32),
        in_specs=[smem, vmem, vmem, vmem, vmem],
        out_specs=vmem,
        cost_estimate=pl.CostEstimate(
            flops=flops, transcendentals=0, bytes_accessed=bytes_accessed),
    )(weight_b, adjs, feats, w_pack, b_pack)

    return h[:, :Z1_DIM], h[:, Z1_DIM:]


def _reference(weight_b, comm_adjs, diff_adjs, feats, params):
    w1, b1, w2, b2, wm1, bm1, wm2, bm2 = params
    comm_agg = jnp.mean(comm_adjs, axis=0)
    diff_agg = jnp.mean(diff_adjs, axis=0)
    final_a = comm_agg * weight_b[0] + diff_agg * weight_b[1]
    u1 = jax.nn.relu(final_a @ feats @ w1 + b1)
    u2 = final_a @ u1 @ w2 + b2
    final_u = (u1 + u2) * 0.5
    h = jax.nn.relu(final_u @ wm1 + bm1)
    h = h @ wm2 + bm2
    return h[:, :Z1_DIM], h[:, Z1_DIM:]


if __name__ == "__main__":
    key = jax.random.PRNGKey(0)
    ks = jax.random.split(key, 16)

    # inputs
    comm_adjs = jax.random.uniform(ks[0], (K_ADJS, N_NODES, N_NODES), jnp.float32)
    diff_adjs = jax.random.uniform(ks[1], (K_ADJS, N_NODES, N_NODES), jnp.float32)
    feats = jax.random.normal(ks[2], (N_NODES, N_FEAT), jnp.float32)

    # parameters (deterministic synthetic init; matches module shapes)
    weight_b = jax.random.uniform(ks[3], (2,), jnp.float32)            # uniform_(0, 1)
    w1 = jax.random.normal(ks[4], (N_FEAT, GN_DIM), jnp.float32) * 0.1
    b1 = jax.random.normal(ks[5], (1, GN_DIM), jnp.float32) * 0.1
    w2 = jax.random.normal(ks[6], (GN_DIM, GN_DIM), jnp.float32) * 0.1
    b2 = jax.random.normal(ks[7], (1, GN_DIM), jnp.float32) * 0.1
    wm1 = jax.random.normal(ks[8], (GN_DIM, MLP_HID), jnp.float32) * 0.1
    bm1 = jax.random.normal(ks[9], (1, MLP_HID), jnp.float32) * 0.1
    wm2 = jax.random.normal(ks[10], (MLP_HID, 2 * Z1_DIM), jnp.float32) * 0.1
    bm2 = jax.random.normal(ks[11], (1, 2 * Z1_DIM), jnp.float32) * 0.1
    params = (w1, b1, w2, b2, wm1, bm1, wm2, bm2)

    mu, logvar = p_z1_gs_e1_forward(weight_b, comm_adjs, diff_adjs, feats, params)
    jax.block_until_ready((mu, logvar))

    mu_ref, logvar_ref = _reference(weight_b, comm_adjs, diff_adjs, feats, params)
    assert mu.shape == (N_NODES, Z1_DIM) and logvar.shape == (N_NODES, Z1_DIM)
    assert jnp.allclose(mu, mu_ref, atol=1e-4, rtol=1e-4)
    assert jnp.allclose(logvar, logvar_ref, atol=1e-4, rtol=1e-4)
    print("KERNEL_OK")
</pallas_src>

<mosaic_0001>
module attributes {stable_mosaic.version = 11 : i64} {
  func.func @p_z1_gs_e1_kernel(%arg0: memref<2xf32, #tpu.memory_space<smem>>, %arg1: memref<6x64x64xf32, #tpu.memory_space<vmem>>, %arg2: memref<64x32xf32, #tpu.memory_space<vmem>>, %arg3: memref<128x32xf32, #tpu.memory_space<vmem>>, %arg4: memref<4x32xf32, #tpu.memory_space<vmem>>, %arg5: memref<64x32xf32, #tpu.memory_space<vmem>>) attributes {dimension_semantics = [], scalar_prefetch = 0 : i64, scratch_operands = 0 : i64, tpu.core_type = #tpu.core_type<tc>} {
    %c0 = arith.constant 0 : index
    %0 = memref.load %arg0[%c0] : memref<2xf32, #tpu.memory_space<smem>>
    %cst = arith.constant 0.333333343 : f32
    %1 = arith.mulf %0, %cst : f32
    %c1 = arith.constant 1 : index
    %2 = memref.load %arg0[%c1] : memref<2xf32, #tpu.memory_space<smem>>
    %cst_0 = arith.constant 0.333333343 : f32
    %3 = arith.mulf %2, %cst_0 : f32
    %c0_1 = arith.constant 0 : index
    %c0_2 = arith.constant 0 : index
    %c0_3 = arith.constant 0 : index
    %4 = vector.load %arg1[%c0_1, %c0_2, %c0_3] : memref<6x64x64xf32, #tpu.memory_space<vmem>>, vector<3x64x64xf32>
    %cst_4 = arith.constant dense<0.000000e+00> : vector<64x64xf32>
    %5 = vector.multi_reduction <add>, %4, %cst_4 [0] : vector<3x64x64xf32> to vector<64x64xf32>
    %c3 = arith.constant 3 : index
    %c0_5 = arith.constant 0 : index
    %c0_6 = arith.constant 0 : index
    %6 = vector.load %arg1[%c3, %c0_5, %c0_6] : memref<6x64x64xf32, #tpu.memory_space<vmem>>, vector<3x64x64xf32>
    %cst_7 = arith.constant dense<0.000000e+00> : vector<64x64xf32>
    %7 = vector.multi_reduction <add>, %6, %cst_7 [0] : vector<3x64x64xf32> to vector<64x64xf32>
    %8 = vector.broadcast %1 : f32 to vector<64x64xf32>
    %9 = arith.mulf %5, %8 : vector<64x64xf32>
    %10 = vector.broadcast %3 : f32 to vector<64x64xf32>
    %11 = arith.mulf %7, %10 : vector<64x64xf32>
    %12 = arith.addf %9, %11 : vector<64x64xf32>
    %c0_8 = arith.constant 0 : index
    %c0_9 = arith.constant 0 : index
    %13 = vector.load %arg3[%c0_8, %c0_9] : memref<128x32xf32, #tpu.memory_space<vmem>>, vector<32x32xf32>
    %c32 = arith.constant 32 : index
    %c0_10 = arith.constant 0 : index
    %14 = vector.load %arg3[%c32, %c0_10] : memref<128x32xf32, #tpu.memory_space<vmem>>, vector<32x32xf32>
    %c64 = arith.constant 64 : index
    %c0_11 = arith.constant 0 : index
    %15 = vector.load %arg3[%c64, %c0_11] : memref<128x32xf32, #tpu.memory_space<vmem>>, vector<32x32xf32>
    %c96 = arith.constant 96 : index
    %c0_12 = arith.constant 0 : index
    %16 = vector.load %arg3[%c96, %c0_12] : memref<128x32xf32, #tpu.memory_space<vmem>>, vector<32x32xf32>
    %c0_13 = arith.constant 0 : index
    %c0_14 = arith.constant 0 : index
    %17 = vector.load %arg4[%c0_13, %c0_14] : memref<4x32xf32, #tpu.memory_space<vmem>>, vector<1x32xf32>
    %c1_15 = arith.constant 1 : index
    %c0_16 = arith.constant 0 : index
    %18 = vector.load %arg4[%c1_15, %c0_16] : memref<4x32xf32, #tpu.memory_space<vmem>>, vector<1x32xf32>
    %c2 = arith.constant 2 : index
    %c0_17 = arith.constant 0 : index
    %19 = vector.load %arg4[%c2, %c0_17] : memref<4x32xf32, #tpu.memory_space<vmem>>, vector<1x32xf32>
    %c3_18 = arith.constant 3 : index
    %c0_19 = arith.constant 0 : index
    %20 = vector.load %arg4[%c3_18, %c0_19] : memref<4x32xf32, #tpu.memory_space<vmem>>, vector<1x32xf32>
    %c0_20 = arith.constant 0 : index
    %c0_21 = arith.constant 0 : index
    %21 = vector.load %arg2[%c0_20, %c0_21] : memref<64x32xf32, #tpu.memory_space<vmem>>, vector<64x32xf32>
    %cst_22 = arith.constant dense<0.000000e+00> : vector<64x32xf32>
    %22 = tpu.matmul %12, %21, %cst_22 {dimension_numbers = #tpu.dot_dimension_numbers<[1], [0], [0], [1], [0, 0, 1, 1], [], []>} : vector<64x64xf32>, vector<64x32xf32>, vector<64x32xf32> -> vector<64x32xf32>
    %cst_23 = arith.constant dense<0.000000e+00> : vector<64x32xf32>
    %23 = tpu.matmul %22, %13, %cst_23 {dimension_numbers = #tpu.dot_dimension_numbers<[1], [0], [0], [1], [0, 0, 1, 1], [], []>} : vector<64x32xf32>, vector<32x32xf32>, vector<64x32xf32> -> vector<64x32xf32>
    %24 = vector.broadcast %17 : vector<1x32xf32> to vector<64x32xf32>
    %25 = arith.addf %23, %24 : vector<64x32xf32>
    %cst_24 = arith.constant 0.000000e+00 : f32
    %26 = vector.broadcast %cst_24 : f32 to vector<64x32xf32>
    %27 = arith.maximumf %25, %26 : vector<64x32xf32>
    %cst_25 = arith.constant dense<0.000000e+00> : vector<64x32xf32>
    %28 = tpu.matmul %12, %27, %cst_25 {dimension_numbers = #tpu.dot_dimension_numbers<[1], [0], [0], [1], [0, 0, 1, 1], [], []>} : vector<64x64xf32>, vector<64x32xf32>, vector<64x32xf32> -> vector<64x32xf32>
    %cst_26 = arith.constant dense<0.000000e+00> : vector<64x32xf32>
    %29 = tpu.matmul %28, %14, %cst_26 {dimension_numbers = #tpu.dot_dimension_numbers<[1], [0], [0], [1], [0, 0, 1, 1], [], []>} : vector<64x32xf32>, vector<32x32xf32>, vector<64x32xf32> -> vector<64x32xf32>
    %30 = vector.broadcast %18 : vector<1x32xf32> to vector<64x32xf32>
    %31 = arith.addf %29, %30 : vector<64x32xf32>
    %32 = arith.addf %27, %31 : vector<64x32xf32>
    %cst_27 = arith.constant 5.000000e-01 : f32
    %33 = vector.broadcast %cst_27 : f32 to vector<64x32xf32>
    %34 = arith.mulf %32, %33 : vector<64x32xf32>
    %cst_28 = arith.constant dense<0.000000e+00> : vector<64x32xf32>
    %35 = tpu.matmul %34, %15, %cst_28 {dimension_numbers = #tpu.dot_dimension_numbers<[1], [0], [0], [1], [0, 0, 1, 1], [], []>} : vector<64x32xf32>, vector<32x32xf32>, vector<64x32xf32> -> vector<64x32xf32>
    %36 = vector.broadcast %19 : vector<1x32xf32> to vector<64x32xf32>
    %37 = arith.addf %35, %36 : vector<64x32xf32>
    %cst_29 = arith.constant 0.000000e+00 : f32
    %38 = vector.broadcast %cst_29 : f32 to vector<64x32xf32>
    %39 = arith.maximumf %37, %38 : vector<64x32xf32>
    %cst_30 = arith.constant dense<0.000000e+00> : vector<64x32xf32>
    %40 = tpu.matmul %39, %16, %cst_30 {dimension_numbers = #tpu.dot_dimension_numbers<[1], [0], [0], [1], [0, 0, 1, 1], [], []>} : vector<64x32xf32>, vector<32x32xf32>, vector<64x32xf32> -> vector<64x32xf32>
    %41 = vector.broadcast %20 : vector<1x32xf32> to vector<64x32xf32>
    %42 = arith.addf %40, %41 : vector<64x32xf32>
    %c0_31 = arith.constant 0 : index
    %c0_32 = arith.constant 0 : index
    %43 = vector.load %arg5[%c0_31, %c0_32] : memref<64x32xf32, #tpu.memory_space<vmem>>, vector<64x32xf32>
    tpu.vector_store %arg5[%c0_31, %c0_32], %42 {strides = array<i32>} : memref<64x32xf32, #tpu.memory_space<vmem>>, vector<64x32xf32>,
    return
  }
}

</mosaic_0001>

<bundles_post_ra>
// kernel: tpu_custom_call.1
= control target key start
LH: loop header
LB: loop body
LE: loop exit
PB: predicated region body
PF: predicated region fallthrough
CT: control target
= control target key end

     0   :  { %10 = vsyncpa [#allocation4], 0  ;;  %s1806_s0 = inlined_call_operand.vmem [shape: f32[2], index: 0, kind: input, shape index: {}]   ;;  %s1807_s1 = inlined_call_operand.hbm [shape: f32[6,64,64], index: 1, kind: input, shape index: {}]   ;;  %s1808_s2 = inlined_call_operand.vmem [shape: f32[64,32], index: 2, kind: input, shape index: {}]   ;;  %s1809_s3 = inlined_call_operand.vmem [shape: f32[128,32], index: 3, kind: input, shape index: {}]   ;;  %s1810_s4 = inlined_call_operand.vmem [shape: f32[4,32], index: 4, kind: input, shape index: {}]   ;;  %s1811_s5 = inlined_call_operand.vmem [shape: f32[64,32], index: 5, kind: output, shape index: {}]  }
   0x1   :  { %s18_s20 = sshll.u32 %s1806_s0, 4  ;;  %s19_s20 = int_to_ptr.vmem [resolvable:$true] %s18_s20 }
   0x2   :  { %11 = vsyncpa [#allocation3], 0  ;;  %s1389_s21 = scalar_lea.vmem %s19_s20, 16  ;;  %p1394_p1 = scmp.lt.s32.totalorder %s19_s20, %s19_s20 }
   0x3   :  { %p1390_p0 = scmp.ne.s32.totalorder %s19_s20, %s1389_s21  ;;  %p1395_p2 = scmp.lt.s32.totalorder %s1389_s21, %s1389_s21 }
   0x5   :  { %p1396_p3 = por %p1395_p2, %p1394_p1 }
   0x7   :  { %p1397_p4 = pnand %p1396_p3, %p1390_p0 }
   0x9   :  { %1400 = shalt.err (!%p1397_p4)
}
   0xa   :  { %s1427_s22 = smov [#allocation2]   ;;  %s1428_s23 = smov [#allocation5]  }
   0xb   :  { %21 = dma.vmem_to_smem %s19_s20, 16, %s1427_s22, [#allocation4]  }
   0xc   :  { %s27_s24 = sshll.u32 %s1428_s23, 4  ;;  %s1401_s27 = scalar_lea.hbm %s1807_s1, 6144  ;;  %s28_s24 = int_to_ptr.vmem [resolvable:$true] %s27_s24 }
   0xd   :  { %p1402_p5 = scmp.ne.s32.totalorder %s1807_s1, %s1401_s27  ;;  %p1405_p6 = scmp.lt.u32.totalorder %s1401_s27, %s1807_s1 }
   0xf   :  { %p1407_p7 = pnand %p1405_p6, %p1402_p5 }
  0x11   :  { %1410 = shalt.err (!%p1407_p7)
}
  0x12   :  { %s1411_s6 = scalar_lea.vmem %s28_s24, 6144  ;;  %p1416_p9 = scmp.lt.s32.totalorder %s28_s24, %s28_s24 }
  0x13   :  { %p1412_p8 = scmp.ne.s32.totalorder %s28_s24, %s1411_s6  ;;  %p1417_p10 = scmp.lt.s32.totalorder %s1411_s6, %s1411_s6 }
  0x15   :  { %p1418_p11 = por %p1417_p10, %p1416_p9 }
  0x17   :  { %p1419_p12 = pnand %p1418_p11, %p1412_p8 }
  0x19   :  { %1422 = shalt.err (!%p1419_p12)
}
  0x1a   :  { %s1429_s7 = smov 128   ;;  %s1430_s8 = smov 8  }
  0x1b   :  { %33 = dma.hbm_to_vmem [thread:$0]  %s1807_s1, 6144, %s28_s24, [#allocation3], %s1429_s7, %s1429_s7, %s1430_s8  }
  0x1c   :  { %1423 = dma.done.wait [#allocation4], 16  }
  0x1d   :  { %1424 = vsyncadd [#allocation4], 4294967280 }
  0x1e   :  { %1425 = dma.done.wait [#allocation3], 6144  }
  0x1f   :  { %1426 = vsyncadd [#allocation3], 4294961152 }
  0x20   :  { %46 = sfence }
  0x21   :  { %v227_v0 = vld [vmem:[%s1808_s2] sm:$0xff]  ;;  %v228_v1 = vld [vmem:[%s1808_s2 + $0x8] sm:$0xff]  ;;  %v229_v2 = vld [vmem:[%s1808_s2 + $0x10] sm:$0xff]  ;;  %s1485_s17 = sld [smem:[#allocation2]]  ;;  %vm75_vm0 = vcmask 523264   ;;  %s1496_s23 = sld [smem:[#allocation2 + $0x1]] }
  0x22   :  { %v1317_v3 = vpack.c.bf16 %v228_v1, %v227_v0  ;;  %v230_v4 = vld [vmem:[%s1808_s2 + $0x18] sm:$0xff]  ;;  %v231_v5 = vld [vmem:[%s1808_s2 + $0x20] sm:$0xff]  ;;  %v232_v6 = vld [vmem:[%s1808_s2 + $0x28] sm:$0xff]  ;;  %vm368_vm1 = vcmask 261120  }
  0x23   :  { %v1321_v7 = vpack.c.bf16 %v230_v4, %v229_v2  ;;  %v233_v8 = vld [vmem:[%s1808_s2 + $0x30] sm:$0xff]  ;;  %v234_v9 = vld [vmem:[%s1808_s2 + $0x38] sm:$0xff]  ;;  %v51_v10 = vld [vmem:[#allocation5] sm:$0xff]  ;;  %v1325_v15 = vpack.c.bf16 %v232_v6, %v231_v5 }
  0x24   :  { %1318 = vmatprep.subr.bf16.mxu0 %v1317_v3  ;;  %v59_v11 = vld [vmem:[#allocation5 + $0x40] sm:$0xff]  ;;  %v76_v13 = vsel %vm75_vm0, %v51_v10, 0.0  ;;  %v52_v21 = vld [vmem:[#allocation5 + $0x8] sm:$0xff]  ;;  %v1511_v29 = vpack.c.bf16 %v234_v9, %v233_v8  ;;  %v53_v39 = vld [vmem:[#allocation5 + $0x10] sm:$0xff] }
  0x25   :  { %v67_v12 = vld [vmem:[#allocation5 + $0x80] sm:$0xff]  ;;  %1320 = vmatpush3.bf16.msra.mxu0 %v1317_v3  ;;  %v77_v16 = vsel %vm75_vm0, %v59_v11, 0.0  ;;  %v60_v25 = vld [vmem:[#allocation5 + $0x48] sm:$0xff]  ;;  %v81_v27 = vsel %vm75_vm0, %v52_v21, 0.0  ;;  %v61_v40 = vld [vmem:[#allocation5 + $0x50] sm:$0xff]  ;;  %v86_v51 = vsel %vm75_vm0, %v53_v39, 0.0 }
  0x26   :  { %v117_v14 = vld [vmem:[#allocation5 + $0xc0] sm:$0xff]  ;;  %v79_v17 = vsel %vm75_vm0, %v67_v12, 0.0  ;;  %1322 = vmatprep.subr.bf16.mxu0 %v1321_v7  ;;  %v78_v22 = vadd.f32 %v77_v16, %v76_v13  ;;  %v68_v26 = vld [vmem:[#allocation5 + $0x88] sm:$0xff]  ;;  %v82_v31 = vsel %vm75_vm0, %v60_v25, 0.0  ;;  %v69_v45 = vld [vmem:[#allocation5 + $0x90] sm:$0xff]  ;;  %v87_v55 = vsel %vm75_vm0, %v61_v40, 0.0 }
  0x27   :  { %v125_v18 = vld [vmem:[#allocation5 + $0x100] sm:$0xff]  ;;  %v141_v20 = vsel %vm75_vm0, %v117_v14, 0.0  ;;  %v118_v28 = vld [vmem:[#allocation5 + $0xc8] sm:$0xff]  ;;  %s48_s2 = smul.f32 0.33333334, %s1485_s17  ;;  %v84_v32 = vsel %vm75_vm0, %v68_v26, 0.0  ;;  %v83_v36 = vadd.f32 %v82_v31, %v81_v27  ;;  %v88_v61 = vadd.f32 %v87_v55, %v86_v51 }
  0x28   :  { %v133_v19 = vld [vmem:[#allocation5 + $0x140] sm:$0xff]  ;;  %v142_v23 = vsel %vm75_vm0, %v125_v18, 0.0  ;;  %v126_v33 = vld [vmem:[#allocation5 + $0x108] sm:$0xff]  ;;  %s50_s28 = smul.f32 0.33333334, %s1496_s23  ;;  %v80_v35 = vadd.f32 %v79_v17, %v78_v22  ;;  %v146_v37 = vsel %vm75_vm0, %v118_v28, 0.0 }
  0x29   :  { %v144_v24 = vsel %vm75_vm0, %v133_v19, 0.0  ;;  %v143_v30 = vadd.f32 %v142_v23, %v141_v20  ;;  %v134_v34 = vld [vmem:[#allocation5 + $0x148] sm:$0xff]  ;;  %v147_v38 = vsel %vm75_vm0, %v126_v33, 0.0  ;;  %1324 = vmatpush3.bf16.msra.mxu0 %v1321_v7  ;;  %v1519_v42 = vstv %s48_s2  ;;  %v119_v46 = vld [vmem:[#allocation5 + $0xd0] sm:$0xff]  ;;  %v54_v57 = vld [vmem:[#allocation5 + $0x18] sm:$0xff] }
  0x2a   :  { %v148_v43 = vadd.f32 %v147_v38, %v146_v37  ;;  %v149_v44 = vsel %vm75_vm0, %v134_v34, 0.0  ;;  %v127_v47 = vld [vmem:[#allocation5 + $0x110] sm:$0xff]  ;;  %1326 = vmatprep.subr.bf16.mxu0 %v1325_v15  ;;  %v182_v48 = vmul.f32 %v1519_v42, %v80_v35  ;;  %v1523_v49 = vstv %s50_s28  ;;  %v62_v58 = vld [vmem:[#allocation5 + $0x58] sm:$0xff]  ;;  %v55_v7 = vld [vmem:[#allocation5 + $0x20] sm:$0xff] }
  0x2b   :  { %v145_v41 = vadd.f32 %v144_v24, %v143_v30  ;;  %v85_v50 = vadd.f32 %v84_v32, %v83_v36  ;;  %v135_v52 = vld [vmem:[#allocation5 + $0x150] sm:$0xff]  ;;  %v89_v56 = vsel %vm75_vm0, %v69_v45, 0.0  ;;  %v70_v59 = vld [vmem:[#allocation5 + $0x98] sm:$0xff]  ;;  %v151_v62 = vsel %vm75_vm0, %v119_v46, 0.0  ;;  %v63_v12 = vld [vmem:[#allocation5 + $0x60] sm:$0xff] }
  0x2c   :  { %v150_v54 = vadd.f32 %v149_v44, %v148_v43  ;;  %v152_v63 = vsel %vm75_vm0, %v127_v47, 0.0  ;;  %v120_v0 = vld [vmem:[#allocation5 + $0xd8] sm:$0xff]  ;;  %v154_v4 = vsel %vm75_vm0, %v135_v52, 0.0  ;;  %v90_v8 = vadd.f32 %v89_v56, %v88_v61  ;;  %v71_v17 = vld [vmem:[#allocation5 + $0xa0] sm:$0xff]  ;;  %v56_v30 = vld [vmem:[#allocation5 + $0x28] sm:$0xff] }
  0x2d   :  { %v191_v53 = vmul.f32 %v1523_v49, %v145_v41  ;;  %v183_v60 = vmul.f32 %v1519_v42, %v85_v50  ;;  %1328 = vmatpush3.bf16.msra.mxu0 %v1325_v15  ;;  %v153_v3 = vadd.f32 %v152_v63, %v151_v62  ;;  %v128_v5 = vld [vmem:[#allocation5 + $0x118] sm:$0xff]  ;;  %v91_v9 = vsel %vm75_vm0, %v54_v57, 0.0  ;;  %v121_v18 = vld [vmem:[#allocation5 + $0xe0] sm:$0xff]  ;;  %v64_v31 = vld [vmem:[#allocation5 + $0x68] sm:$0xff] }
  0x2e   :  { %v192_v2 = vmul.f32 %v1523_v49, %v150_v54  ;;  %v136_v6 = vld [vmem:[#allocation5 + $0x158] sm:$0xff]  ;;  %1330 = vmatprep.subr.bf16.mxu0 %v1511_v29  ;;  %v92_v10 = vsel %vm75_vm0, %v62_v58, 0.0  ;;  %v94_v11 = vsel %vm75_vm0, %v70_v59, 0.0  ;;  %v156_v16 = vsel %vm75_vm0, %v120_v0, 0.0  ;;  %v129_v19 = vld [vmem:[#allocation5 + $0x120] sm:$0xff]  ;;  %v72_v36 = vld [vmem:[#allocation5 + $0xa8] sm:$0xff] }
  0x2f   :  { %v1532_v1 = vadd.f32 %v191_v53, %v182_v48  ;;  %v155_v14 = vadd.f32 %v154_v4, %v153_v3  ;;  %v93_v15 = vadd.f32 %v92_v10, %v91_v9  ;;  %v184_v20 = vmul.f32 %v1519_v42, %v90_v8  ;;  %v137_v28 = vld [vmem:[#allocation5 + $0x160] sm:$0xff]  ;;  %v122_v40 = vld [vmem:[#allocation5 + $0xe8] sm:$0xff]  ;;  %v57_v48 = vld [vmem:[#allocation5 + $0x30] sm:$0xff] }
  0x30   :  { %v1542_v13 = vadd.f32 %v192_v2, %v183_v60  ;;  %v157_v21 = vsel %vm75_vm0, %v128_v5, 0.0  ;;  %v159_v22 = vsel %vm75_vm0, %v136_v6, 0.0  ;;  %v96_v23 = vsel %vm75_vm0, %v55_v7, 0.0  ;;  %v130_v41 = vld [vmem:[#allocation5 + $0x128] sm:$0xff]  ;;  %v65_v54 = vld [vmem:[#allocation5 + $0x70] sm:$0xff]  ;;  %v58_v4 = vld [vmem:[#allocation5 + $0x38] sm:$0xff] }
  0x31   :  { %1197 = vmatprep.mubr.msk.f32.mxu0 %vm75_vm0, %v1532_v1  ;;  %1332 = vmatpush3.bf16.msra.mxu0 %v1511_v29  ;;  %v193_v24 = vmul.f32 %v1523_v49, %v155_v14  ;;  %v95_v25 = vadd.f32 %v94_v11, %v93_v15  ;;  %v158_v26 = vadd.f32 %v157_v21, %v156_v16  ;;  %v97_v27 = vsel %vm75_vm0, %v63_v12, 0.0  ;;  %v138_v43 = vld [vmem:[#allocation5 + $0x168] sm:$0xff]  ;;  %v73_v55 = vld [vmem:[#allocation5 + $0xb0] sm:$0xff]  ;;  %v66_v5 = vld [vmem:[#allocation5 + $0x78] sm:$0xff] }
  0x32   :  { %v98_v32 = vadd.f32 %v97_v27, %v96_v23  ;;  %v99_v33 = vsel %vm75_vm0, %v71_v17, 0.0  ;;  %v161_v34 = vsel %vm75_vm0, %v121_v18, 0.0  ;;  %v162_v35 = vsel %vm75_vm0, %v129_v19, 0.0  ;;  %v123_v56 = vld [vmem:[#allocation5 + $0xf0] sm:$0xff]  ;;  %v74_v10 = vld [vmem:[#allocation5 + $0xb8] sm:$0xff]  ;;  %v207_v23 = vld [vmem:[%s1809_s3] sm:$0xff] }
  0x33   :  { %v1555_v37 = vadd.f32 %v193_v24, %v184_v20  ;;  %v160_v29 = vadd.f32 %v159_v22, %v158_v26  ;;  %v185_v38 = vmul.f32 %v1519_v42, %v95_v25  ;;  %v163_v39 = vadd.f32 %v162_v35, %v161_v34  ;;  %v131_v61 = vld [vmem:[#allocation5 + $0x130] sm:$0xff]  ;;  %v124_v16 = vld [vmem:[#allocation5 + $0xf8] sm:$0xff] }
  0x34   :  { %1198 = vmatmul.mubr.msk.f32.vlgmr.msra.gmra.mrb[0].mxu0 %vm75_vm0, %v1542_v13  ;;  %v100_v44 = vadd.f32 %v99_v33, %v98_v32  ;;  %v164_v45 = vsel %vm75_vm0, %v137_v28, 0.0  ;;  %v101_v46 = vsel %vm75_vm0, %v56_v30, 0.0  ;;  %v102_v47 = vsel %vm75_vm0, %v64_v31, 0.0  ;;  %v139_v3 = vld [vmem:[#allocation5 + $0x170] sm:$0xff]  ;;  %v132_v17 = vld [vmem:[#allocation5 + $0x138] sm:$0xff]  ;;  %v208_v28 = vld [vmem:[%s1809_s3 + $0x8] sm:$0xff] }
  0x35   :  { %1200 = vmatprep.mubr.msk.f32.mxu0 %vm75_vm0, %v1555_v37  ;;  %v194_v50 = vmul.f32 %v1523_v49, %v160_v29  ;;  %v165_v51 = vadd.f32 %v164_v45, %v163_v39  ;;  %v103_v52 = vadd.f32 %v102_v47, %v101_v46  ;;  %v104_v53 = vsel %vm75_vm0, %v72_v36, 0.0  ;;  %v140_v18 = vld [vmem:[#allocation5 + $0x178] sm:$0xff]  ;;  %v209_v30 = vld [vmem:[%s1809_s3 + $0x10] sm:$0xff] }
  0x36   :  { %v186_v57 = vmul.f32 %v1519_v42, %v100_v44  ;;  %v166_v58 = vsel %vm75_vm0, %v122_v40, 0.0  ;;  %v167_v59 = vsel %vm75_vm0, %v130_v41, 0.0  ;;  %v169_v60 = vsel %vm75_vm0, %v138_v43, 0.0  ;;  %v210_v31 = vld [vmem:[%s1809_s3 + $0x18] sm:$0xff] }
  0x37   :  { %v1571_v62 = vadd.f32 %v194_v50, %v185_v38  ;;  %v195_v63 = vmul.f32 %v1523_v49, %v165_v51  ;;  %v105_v0 = vadd.f32 %v104_v53, %v103_v52  ;;  %v168_v2 = vadd.f32 %v167_v59, %v166_v58  ;;  %v212_v58 = vld [vmem:[%s1809_s3 + $0x28] sm:$0xff]  ;;  %v213_v59 = vld [vmem:[%s1809_s3 + $0x30] sm:$0xff] }
  0x38   :  { %v106_v6 = vsel %vm75_vm0, %v57_v48, 0.0  ;;  %v107_v7 = vsel %vm75_vm0, %v65_v54, 0.0  ;;  %v109_v8 = vsel %vm75_vm0, %v73_v55, 0.0  ;;  %v171_v9 = vsel %vm75_vm0, %v123_v56, 0.0 }
  0x39   :  { %1201 = vmatmul.mubr.msk.f32.gmra.mrb[2].mxu0 %vm75_vm0, %v1571_v62  ;;  %v1580_v11 = vadd.f32 %v195_v63, %v186_v57  ;;  %v170_v12 = vadd.f32 %v169_v60, %v168_v2  ;;  %v187_v14 = vmul.f32 %v1519_v42, %v105_v0  ;;  %v108_v15 = vadd.f32 %v107_v7, %v106_v6  ;;  %v211_v57 = vld [vmem:[%s1809_s3 + $0x20] sm:$0xff] }
  0x3a   :  { %v172_v19 = vsel %vm75_vm0, %v131_v61, 0.0  ;;  %v174_v20 = vsel %vm75_vm0, %v139_v3, 0.0  ;;  %v111_v21 = vsel %vm75_vm0, %v58_v4, 0.0  ;;  %v112_v22 = vsel %vm75_vm0, %v66_v5, 0.0  ;;  %v214_v61 = vld [vmem:[%s1809_s3 + $0x38] sm:$0xff] }
  0x3b   :  { %1203 = vmatprep.mubr.msk.f32.mxu0 %vm75_vm0, %v1580_v11  ;;  %v196_v24 = vmul.f32 %v1523_v49, %v170_v12  ;;  %v110_v25 = vadd.f32 %v109_v8, %v108_v15  ;;  %v173_v26 = vadd.f32 %v172_v19, %v171_v9  ;;  %v113_v27 = vadd.f32 %v112_v22, %v111_v21 }
  0x3c   :  { %v114_v32 = vsel %vm75_vm0, %v74_v10, 0.0  ;;  %v176_v33 = vsel %vm75_vm0, %v124_v16, 0.0  ;;  %v177_v34 = vsel %vm75_vm0, %v132_v17, 0.0  ;;  %v179_v35 = vsel %vm75_vm0, %v140_v18, 0.0 }
  0x3d   :  { %v1606_v36 = vadd.f32 %v196_v24, %v187_v14  ;;  %v175_v29 = vadd.f32 %v174_v20, %v173_v26  ;;  %v188_v38 = vmul.f32 %v1519_v42, %v110_v25  ;;  %v115_v39 = vadd.f32 %v114_v32, %v113_v27 }
  0x3e   :  { %v178_v40 = vadd.f32 %v177_v34, %v176_v33  ;;  %v1333_v41 = vpack.c.bf16 %v208_v28, %v207_v23  ;;  %v1337_v43 = vpack.c.bf16 %v210_v31, %v209_v30  ;;  %v1357_v60 = vpack.c.bf16 %v212_v58, %v211_v57 }
  0x3f   :  { %1204 = vmatmul.mubr.msk.f32.gmra.mrb[4].mxu0 %vm75_vm0, %v1606_v36  ;;  %v197_v44 = vmul.f32 %v1523_v49, %v175_v29  ;;  %v189_v46 = vmul.f32 %v1519_v42, %v115_v39  ;;  %v1361_v63 = vpack.c.bf16 %v214_v61, %v213_v59  ;;  %v217_v39 = vld [vmem:[%s1809_s3 + $0x50] sm:$0xff] }
  0x40   :  { %v180_v45 = vadd.f32 %v179_v35, %v178_v40  ;;  %1334 = vmatprep.subr.bf16.mxu1 %v1333_v41  ;;  %1358 = vmatprep.subr.bf16.mxu0 %v1357_v60  ;;  %v218_v40 = vld [vmem:[%s1809_s3 + $0x58] sm:$0xff] }
  0x41   :  { %v1613_v47 = vadd.f32 %v197_v44, %v188_v38  ;;  %1336 = vmatpush3.bf16.msra.mxu1 %v1333_v41  ;;  %1360 = vmatpush3.bf16.msra.mxu0 %v1357_v60  ;;  %v1369_v41 = vpack.c.bf16 %v218_v40, %v217_v39  ;;  %v220_v44 = vld [vmem:[%s1809_s3 + $0x68] sm:$0xff] }
  0x42   :  { %v198_v48 = vmul.f32 %v1523_v49, %v180_v45  ;;  %1338 = vmatprep.subr.bf16.mxu1 %v1337_v43  ;;  %1362 = vmatprep.subr.bf16.mxu0 %v1361_v63 }
  0x43   :  { %1206 = vmatprep.mubr.msk.f32.mxu0 %vm75_vm0, %v1613_v47 }
  0x44   :  { %v1618_v50 = vadd.f32 %v198_v48, %v189_v46  ;;  %v1074_v46 = vld [vmem:[%s1810_s4 + $0x1] ss:$0 sm:$0xff] }
  0x45   :  { %1340 = vmatpush3.bf16.msra.mxu1 %v1337_v43  ;;  %1364 = vmatpush3.bf16.msra.mxu0 %v1361_v63  ;;  %v219_v43 = vld [vmem:[%s1809_s3 + $0x60] sm:$0xff] }
  0x46   :  { %1207 = vmatmul.mubr.msk.f32.gmra.mrb[6].mxu0 %vm75_vm0, %v1618_v50  ;;  %v1373_v45 = vpack.c.bf16 %v220_v44, %v219_v43  ;;  %v1092_v43 = vld [vmem:[%s1810_s4 + $0x3] ss:$0 sm:$0xff] }
  0x48   :  { %1374 = vmatprep.subr.bf16.mxu0 %v1373_v45 }
 0x107   :  { %v1199_v51 = vpop.f32.mrb[0].mxu0 }
 0x108   :  { %v325_v52 = vpop.f32.mrb[1].mxu0 }
 0x109   :  { %1217 = vmatprep.mubr.msk.f32.mxu1 %vm368_vm1, %v325_v52 }
 0x10a   :  { %1218 = vmatmul.mubr.msk.f32.vlgmr.msra.gmra.mrb[0].mxu1 %vm368_vm1, %v1199_v51 }
 0x10c   :  { %v1202_v42 = vpop.f32.mrb[2].mxu0 }
 0x10d   :  { %v335_v53 = vpop.f32.mrb[3].mxu0 }
 0x10e   :  { %1220 = vmatprep.mubr.msk.f32.mxu1 %vm368_vm1, %v335_v53 }
 0x10f   :  { %1221 = vmatmul.mubr.msk.f32.gmra.mrb[2].mxu1 %vm368_vm1, %v1202_v42 }
 0x112   :  { %v1205_v49 = vpop.f32.mrb[4].mxu0 }
 0x113   :  { %v345_v54 = vpop.f32.mrb[5].mxu0 }
 0x114   :  { %1223 = vmatprep.mubr.msk.f32.mxu1 %vm368_vm1, %v345_v54 }
 0x115   :  { %1224 = vmatmul.mubr.msk.f32.gmra.mrb[4].mxu1 %vm368_vm1, %v1205_v49 }
 0x119   :  { %v1208_v55 = vpop.f32.mrb[6].mxu0 }
 0x11a   :  { %v355_v56 = vpop.f32.mrb[7].mxu0 }
 0x11b   :  { %1226 = vmatprep.mubr.msk.f32.mxu1 %vm368_vm1, %v355_v56 }
 0x11c   :  { %1227 = vmatmul.mubr.msk.f32.gmra.mrb[6].mxu1 %vm368_vm1, %v1208_v55 }
 0x11d   :  { %1245 = vmatprep.mubr.msk.f32.mxu1 %vm75_vm0, %v1532_v1  ;;  %v1057_v1 = vld [vmem:[%s1810_s4] ss:$0 sm:$0xff] }
 0x1dd   :  { %v1219_v0 = vpop.f32.mrb[0].mxu1 }
 0x1de   :  { %v1647_v2 = vadd.f32 %v1219_v0, %v1057_v1  ;;  %v459_v3 = vpop.f32.mrb[1].mxu1 }
 0x1df   :  { %v1649_v4 = vadd.f32 %v1057_v1, %v459_v3 }
 0x1e0   :  { %v499_v5 = vmax.f32 %v1647_v2, 0.0 }
 0x1e1   :  { %v498_v6 = vmax.f32 %v1649_v4, 0.0 }
 0x1e2   :  { %v1222_v7 = vpop.f32.mrb[2].mxu1 }
 0x1e3   :  { %v1341_v8 = vpack.c.bf16 %v499_v5, %v498_v6  ;;  %v1657_v9 = vadd.f32 %v1222_v7, %v1057_v1  ;;  %v469_v10 = vpop.f32.mrb[3].mxu1 }
 0x1e4   :  { %v1659_v12 = vadd.f32 %v1057_v1, %v469_v10 }
 0x1e5   :  { %v501_v14 = vmax.f32 %v1657_v9, 0.0  ;;  %1342 = vmatprep.subr.bf16.mxu1 %v1341_v8 }
 0x1e6   :  { %v500_v15 = vmax.f32 %v1659_v12, 0.0  ;;  %1344 = vmatpush3.bf16.msra.mxu1 %v1341_v8 }
 0x1e8   :  { %v1345_v16 = vpack.c.bf16 %v501_v14, %v500_v15  ;;  %v1225_v17 = vpop.f32.mrb[4].mxu1 }
 0x1e9   :  { %v1667_v18 = vadd.f32 %v1225_v17, %v1057_v1  ;;  %v479_v19 = vpop.f32.mrb[5].mxu1  ;;  %v221_v17 = vld [vmem:[%s1809_s3 + $0x70] sm:$0xff] }
 0x1ea   :  { %v1669_v20 = vadd.f32 %v1057_v1, %v479_v19  ;;  %1346 = vmatprep.subr.bf16.mxu1 %v1345_v16 }
 0x1eb   :  { %v503_v21 = vmax.f32 %v1667_v18, 0.0  ;;  %1348 = vmatpush3.bf16.msra.mxu1 %v1345_v16  ;;  %v222_v18 = vld [vmem:[%s1809_s3 + $0x78] sm:$0xff] }
 0x1ec   :  { %v502_v22 = vmax.f32 %v1669_v20, 0.0  ;;  %v1377_v19 = vpack.c.bf16 %v222_v18, %v221_v17  ;;  %v1083_v20 = vld [vmem:[%s1810_s4 + $0x2] ss:$0 sm:$0xff] }
 0x1ee   :  { %v1349_v23 = vpack.c.bf16 %v503_v21, %v502_v22 }
 0x1ef   :  { %v1228_v24 = vpop.f32.mrb[6].mxu1 }
 0x1f0   :  { %v1677_v25 = vadd.f32 %v1228_v24, %v1057_v1  ;;  %v489_v26 = vpop.f32.mrb[7].mxu1  ;;  %1350 = vmatprep.subr.bf16.mxu1 %v1349_v23 }
 0x1f1   :  { %v1679_v27 = vadd.f32 %v1057_v1, %v489_v26  ;;  %1352 = vmatpush3.bf16.msra.mxu1 %v1349_v23 }
 0x1f2   :  { %v505_v28 = vmax.f32 %v1677_v25, 0.0 }
 0x1f3   :  { %v504_v30 = vmax.f32 %v1679_v27, 0.0 }
 0x1f5   :  { %v1353_v31 = vpack.c.bf16 %v505_v28, %v504_v30 }
 0x1f7   :  { %1354 = vmatprep.subr.bf16.mxu1 %v1353_v31 }
 0x1f8   :  { %1356 = vmatpush3.bf16.msra.mxu1 %v1353_v31 }
 0x1fb   :  { %1246 = vmatmul.mubr.msk.f32.vlgmr.msra.gmra.mrb[8].mxu1 %vm75_vm0, %v1542_v13  ;;  %v215_v13 = vld [vmem:[%s1809_s3 + $0x40] sm:$0xff] }
 0x1fc   :  { %1248 = vmatprep.mubr.msk.f32.mxu1 %vm75_vm0, %v1555_v37  ;;  %v216_v37 = vld [vmem:[%s1809_s3 + $0x48] sm:$0xff] }
 0x1ff   :  { %1249 = vmatmul.mubr.msk.f32.gmra.mrb[10].mxu1 %vm75_vm0, %v1571_v62  ;;  %v1365_v62 = vpack.c.bf16 %v216_v37, %v215_v13 }
 0x200   :  { %1251 = vmatprep.mubr.msk.f32.mxu1 %vm75_vm0, %v1580_v11 }
 0x201   :  { %1366 = vmatprep.subr.bf16.mxu1 %v1365_v62 }
 0x202   :  { %1368 = vmatpush3.bf16.msra.mxu1 %v1365_v62 }
 0x203   :  { %1252 = vmatmul.mubr.msk.f32.gmra.mrb[12].mxu1 %vm75_vm0, %v1606_v36  ;;  %1370 = vmatprep.subr.bf16.mxu1 %v1369_v41 }
 0x204   :  { %1254 = vmatprep.mubr.msk.f32.mxu1 %vm75_vm0, %v1613_v47 }
 0x206   :  { %1372 = vmatpush3.bf16.msra.mxu1 %v1369_v41 }
 0x207   :  { %1255 = vmatmul.mubr.msk.f32.gmra.mrb[14].mxu1 %vm75_vm0, %v1618_v50  ;;  %1381 = vmatprep.subr.bf16.mxu1 %v1373_v45 }
 0x2ce   :  { %v1247_v11 = vpop.f32.mrb[8].mxu1 }
 0x2cf   :  { %v572_v32 = vpop.f32.mrb[9].mxu1 }
 0x2d0   :  { %1265 = vmatprep.mubr.msk.f32.mxu0 %vm368_vm1, %v572_v32 }
 0x2d1   :  { %1266 = vmatmul.mubr.msk.f32.vlgmr.msra.gmra.mrb[8].mxu0 %vm368_vm1, %v1247_v11 }
 0x2d2   :  { %v1250_v33 = vpop.f32.mrb[10].mxu1  ;;  %1376 = vmatpush3.bf16.msra.mxu0 %v1373_v45 }
 0x2d3   :  { %v582_v34 = vpop.f32.mrb[11].mxu1  ;;  %1378 = vmatprep.subr.bf16.mxu0 %v1377_v19 }
 0x2d4   :  { %1268 = vmatprep.mubr.msk.f32.mxu0 %vm368_vm1, %v582_v34 }
 0x2d5   :  { %1269 = vmatmul.mubr.msk.f32.gmra.mrb[10].mxu0 %vm368_vm1, %v1250_v33 }
 0x2d6   :  { %v1253_v35 = vpop.f32.mrb[12].mxu1  ;;  %1380 = vmatpush3.bf16.msra.mxu0 %v1377_v19 }
 0x2d7   :  { %v592_v36 = vpop.f32.mrb[13].mxu1 }
 0x2d8   :  { %1271 = vmatprep.mubr.msk.f32.mxu0 %vm368_vm1, %v592_v36 }
 0x2d9   :  { %1272 = vmatmul.mubr.msk.f32.gmra.mrb[12].mxu0 %vm368_vm1, %v1253_v35 }
 0x2da   :  { %v1256_v29 = vpop.f32.mrb[14].mxu1 }
 0x2db   :  { %v602_v38 = vpop.f32.mrb[15].mxu1 }
 0x2dc   :  { %1274 = vmatprep.mubr.msk.f32.mxu0 %vm368_vm1, %v602_v38 }
 0x2dd   :  { %1275 = vmatmul.mubr.msk.f32.gmra.mrb[14].mxu0 %vm368_vm1, %v1256_v29 }
 0x3a4   :  { %v1267_v47 = vpop.f32.mrb[8].mxu0 }
 0x3a5   :  { %v711_v48 = vadd.f32 %v1267_v47, %v1074_v46  ;;  %v705_v50 = vpop.f32.mrb[9].mxu0 }
 0x3a6   :  { %v706_v51 = vadd.f32 %v1074_v46, %v705_v50 }
 0x3a7   :  { %v745_v52 = vadd.f32 %v711_v48, %v499_v5 }
 0x3a8   :  { %v744_v42 = vadd.f32 %v706_v51, %v498_v6  ;;  %v1270_v53 = vpop.f32.mrb[10].mxu0 }
 0x3a9   :  { %v721_v49 = vadd.f32 %v1270_v53, %v1074_v46  ;;  %v715_v54 = vpop.f32.mrb[11].mxu0  ;;  %v753_v57 = vmul.f32 0.5, %v745_v52 }
 0x3aa   :  { %v752_v55 = vmul.f32 0.5, %v744_v42  ;;  %v716_v56 = vadd.f32 %v1074_v46, %v715_v54 }
 0x3ab   :  { %v747_v58 = vadd.f32 %v721_v49, %v501_v14 }
 0x3ac   :  { %v746_v59 = vadd.f32 %v716_v56, %v500_v15  ;;  %v1273_v60 = vpop.f32.mrb[12].mxu0  ;;  %1285 = vmatprep.mubr.msk.f32.mxu1 %vm368_vm1, %v752_v55 }
 0x3ad   :  { %v731_v61 = vadd.f32 %v1273_v60, %v1074_v46  ;;  %v725_v63 = vpop.f32.mrb[13].mxu0  ;;  %1286 = vmatmul.mubr.msk.f32.vlgmr.msra.gmra.mrb[16].mxu1 %vm368_vm1, %v753_v57  ;;  %v755_v2 = vmul.f32 0.5, %v747_v58 }
 0x3ae   :  { %v754_v1 = vmul.f32 0.5, %v746_v59  ;;  %v726_v0 = vadd.f32 %v1074_v46, %v725_v63  ;;  %1383 = vmatpush3.bf16.msra.mxu1 %v1373_v45 }
 0x3af   :  { %v749_v3 = vadd.f32 %v731_v61, %v503_v21  ;;  %1382 = vmatprep.subr.bf16.mxu1 %v1377_v19 }
 0x3b0   :  { %v748_v4 = vadd.f32 %v726_v0, %v502_v22  ;;  %v1276_v5 = vpop.f32.mrb[14].mxu0  ;;  %1288 = vmatprep.mubr.msk.f32.mxu1 %vm368_vm1, %v754_v1 }
 0x3b1   :  { %v741_v6 = vadd.f32 %v1276_v5, %v1074_v46  ;;  %v735_v7 = vpop.f32.mrb[15].mxu0  ;;  %1289 = vmatmul.mubr.msk.f32.gmra.mrb[18].mxu1 %vm368_vm1, %v755_v2  ;;  %v757_v10 = vmul.f32 0.5, %v749_v3 }
 0x3b2   :  { %v756_v8 = vmul.f32 0.5, %v748_v4  ;;  %v736_v9 = vadd.f32 %v1074_v46, %v735_v7  ;;  %1384 = vmatpush3.bf16.msra.mxu1 %v1377_v19 }
 0x3b3   :  { %v751_v12 = vadd.f32 %v741_v6, %v505_v28 }
 0x3b4   :  { %v750_v14 = vadd.f32 %v736_v9, %v504_v30  ;;  %1291 = vmatprep.mubr.msk.f32.mxu1 %vm368_vm1, %v756_v8 }
 0x3b5   :  { %1292 = vmatmul.mubr.msk.f32.gmra.mrb[20].mxu1 %vm368_vm1, %v757_v10  ;;  %v759_v16 = vmul.f32 0.5, %v751_v12 }
 0x3b6   :  { %v758_v15 = vmul.f32 0.5, %v750_v14 }
 0x3b8   :  { %1294 = vmatprep.mubr.msk.f32.mxu1 %vm368_vm1, %v758_v15 }
 0x3b9   :  { %1295 = vmatmul.mubr.msk.f32.gmra.mrb[22].mxu1 %vm368_vm1, %v759_v16 }
 0x480   :  { %v1287_v21 = vpop.f32.mrb[16].mxu1 }
 0x481   :  { %v860_v22 = vadd.f32 %v1287_v21, %v1083_v20  ;;  %v854_v23 = vpop.f32.mrb[17].mxu1 }
 0x482   :  { %v855_v24 = vadd.f32 %v1083_v20, %v854_v23 }
 0x483   :  { %v894_v27 = vmax.f32 %v860_v22, 0.0 }
 0x484   :  { %v893_v25 = vmax.f32 %v855_v24, 0.0  ;;  %v1290_v26 = vpop.f32.mrb[18].mxu1 }
 0x485   :  { %v870_v28 = vadd.f32 %v1290_v26, %v1083_v20  ;;  %v864_v30 = vpop.f32.mrb[19].mxu1 }
 0x486   :  { %v865_v31 = vadd.f32 %v1083_v20, %v864_v30  ;;  %1305 = vmatprep.mubr.msk.f32.mxu0 %vm368_vm1, %v893_v25 }
 0x487   :  { %1306 = vmatmul.mubr.msk.f32.vlgmr.msra.gmra.mrb[16].mxu0 %vm368_vm1, %v894_v27  ;;  %v896_v62 = vmax.f32 %v870_v28, 0.0 }
 0x488   :  { %v895_v13 = vmax.f32 %v865_v31, 0.0  ;;  %v1293_v37 = vpop.f32.mrb[20].mxu1 }
 0x489   :  { %v880_v11 = vadd.f32 %v1293_v37, %v1083_v20  ;;  %v874_v32 = vpop.f32.mrb[21].mxu1 }
 0x48a   :  { %v875_v33 = vadd.f32 %v1083_v20, %v874_v32  ;;  %1308 = vmatprep.mubr.msk.f32.mxu0 %vm368_vm1, %v895_v13 }
 0x48b   :  { %1309 = vmatmul.mubr.msk.f32.gmra.mrb[18].mxu0 %vm368_vm1, %v896_v62  ;;  %v898_v36 = vmax.f32 %v880_v11, 0.0 }
 0x48c   :  { %v897_v34 = vmax.f32 %v875_v33, 0.0  ;;  %v1296_v35 = vpop.f32.mrb[22].mxu1 }
 0x48d   :  { %v890_v29 = vadd.f32 %v1296_v35, %v1083_v20  ;;  %v884_v38 = vpop.f32.mrb[23].mxu1 }
 0x48e   :  { %v885_v39 = vadd.f32 %v1083_v20, %v884_v38  ;;  %1311 = vmatprep.mubr.msk.f32.mxu0 %vm368_vm1, %v897_v34 }
 0x48f   :  { %1312 = vmatmul.mubr.msk.f32.gmra.mrb[20].mxu0 %vm368_vm1, %v898_v36  ;;  %v900_v41 = vmax.f32 %v890_v29, 0.0 }
 0x490   :  { %v899_v40 = vmax.f32 %v885_v39, 0.0 }
 0x492   :  { %1314 = vmatprep.mubr.msk.f32.mxu1 %vm368_vm1, %v899_v40 }
 0x493   :  { %1315 = vmatmul.mubr.msk.f32.vlgmr.msra.gmra.mrb[24].mxu1 %vm368_vm1, %v900_v41 }
 0x55a   :  { %v1307_v44 = vpop.f32.mrb[16].mxu0 }
 0x55b   :  { %v1001_v45 = vadd.f32 %v1307_v44, %v1092_v43  ;;  %v995_v46 = vpop.f32.mrb[17].mxu0 }
 0x55c   :  { %v996_v47 = vadd.f32 %v1092_v43, %v995_v46 }
 0x55d   :  { %1035 = vst.msk [vmem:[%s1811_s5 + $0x8] sm:$0xff] %vm368_vm1, %v1001_v45 }
 0x55e   :  { %1034 = vst.msk [vmem:[%s1811_s5] sm:$0xff] %vm368_vm1, %v996_v47  ;;  %v1310_v48 = vpop.f32.mrb[18].mxu0 }
 0x55f   :  { %v1011_v50 = vadd.f32 %v1310_v48, %v1092_v43  ;;  %v1005_v51 = vpop.f32.mrb[19].mxu0 }
 0x560   :  { %v1006_v52 = vadd.f32 %v1092_v43, %v1005_v51 }
 0x561   :  { %1037 = vst.msk [vmem:[%s1811_s5 + $0x18] sm:$0xff] %vm368_vm1, %v1011_v50 }
 0x562   :  { %1036 = vst.msk [vmem:[%s1811_s5 + $0x10] sm:$0xff] %vm368_vm1, %v1006_v52  ;;  %v1313_v42 = vpop.f32.mrb[20].mxu0 }
 0x563   :  { %v1021_v53 = vadd.f32 %v1313_v42, %v1092_v43  ;;  %v1015_v49 = vpop.f32.mrb[21].mxu0 }
 0x564   :  { %v1016_v54 = vadd.f32 %v1092_v43, %v1015_v49 }
 0x565   :  { %1039 = vst.msk [vmem:[%s1811_s5 + $0x28] sm:$0xff] %vm368_vm1, %v1021_v53 }
 0x566   :  { %1038 = vst.msk [vmem:[%s1811_s5 + $0x20] sm:$0xff] %vm368_vm1, %v1016_v54  ;;  %v1316_v55 = vpop.f32.mrb[24].mxu1 }
 0x567   :  { %v1031_v56 = vadd.f32 %v1316_v55, %v1092_v43  ;;  %v1025_v57 = vpop.f32.mrb[25].mxu1 }
 0x568   :  { %v1026_v58 = vadd.f32 %v1092_v43, %v1025_v57 }
 0x569   :  { %1041 = vst.msk [vmem:[%s1811_s5 + $0x38] sm:$0xff] %vm368_vm1, %v1031_v56 }
 0x56a   :  { %1040 = vst.msk [vmem:[%s1811_s5 + $0x30] sm:$0xff] %vm368_vm1, %v1026_v58 }
 0x56b   :  { %1046 = vsyncpa [#allocation3], 1 }
 0x56c   :  { %1047 = vsyncpa [#allocation4], 1 }

</bundles_post_ra>
